<compile_context>
chip_gen: v7x
topology: tpu7x:2x2x1
jax: 0.10.0
libtpu: 0.0.40
codegen_flags: <defaults>
</compile_context>

<pallas_src>
import functools

import jax
import jax.numpy as jnp
from jax.experimental import pallas as pl
from jax.experimental.pallas import tpu as pltpu


# ----------------------------- config ---------------------------------------
class Config:
    count_threshold = 0
    radius = 1
    len_feature = 8
    tsdf_scale = 1.0
    p_dropout = 0.0
    n_points = 64
    activation = "ReLU"


def index_shift(radius):
    """All (2r+1)^3 integer offsets in [-r, r]^3, shape (K, 3) (meshgrid 'ij')."""
    r = jnp.arange(-radius, radius + 1, dtype=jnp.int32)
    dx, dy, dz = jnp.meshgrid(r, r, r, indexing="ij")
    return jnp.stack([dx.ravel(), dy.ravel(), dz.ravel()], axis=-1)  # (K, 3)


def _default_pack():
    """Queries packed per lane row: 8 (K=128) on v5e/older, 16 (K=256) fills
    the 256-deep MXU on v6e/v7x.  Any value is mathematically identical."""
    try:
        kind = jax.devices()[0].device_kind.lower()
    except Exception:
        return 8
    return 16 if ("v6" in kind or "v7" in kind) else 8


# ---------------- JAX glue: fold Interpolator linear into the volume ---------
def fold_interpolator_linear(feature_volume, wlin, blin, radius):
    """lin_vol[i,j,k] = blin + sum_s feat_padded[(i,j,k)+r+s] @ wlin_block(s).

    Mathematically identical to `gathered @ wlin + blin` for every voxel, done
    once over the (tiny) feature volume instead of per query row.
    """
    X, Y, Z, F_ = feature_volume.shape
    k = 2 * radius + 1
    padded = jnp.pad(feature_volume.astype(jnp.float32),
                     ((radius, radius),) * 3 + ((0, 0),))
    w = wlin.reshape(k, k, k, F_, F_)          # matches index_shift ordering
    lin = jnp.zeros((X, Y, Z, F_), jnp.float32) + blin.reshape(1, 1, 1, F_)
    for a in range(k):
        for b in range(k):
            for c in range(k):
                window = padded[a:a + X, b:b + Y, c:c + Z, :]
                lin = lin + jnp.einsum("xyzf,fg->xyzg", window, w[a, b, c],
                                       precision=jax.lax.Precision.HIGHEST)
    return lin


def build_mlp_input(query_indices, feature_volume, lin_volume):
    """Single gather of per-query [query_feature, interpolated_feature] -> (N, 2F)."""
    # TODO(synk): data-dependent 3-D point gather stays in JAX glue (no
    # rectangular BlockSpec equivalent; would need manual per-row DMA gather).
    qi = query_indices.reshape(-1, 3).astype(jnp.int32)
    combined = jnp.concatenate(
        [feature_volume.astype(jnp.float32), lin_volume], axis=-1)   # tiny volume
    return combined[qi[:, 0], qi[:, 1], qi[:, 2]]                    # (N, 2F)


# ------------------------------ Pallas kernel --------------------------------
def translate_mlp_kernel(x_ref,
                         w1_ref, b1_ref,
                         w2x_ref, w2h_ref, b2_ref,
                         w3x_ref, w3h_ref, b3_ref,
                         w4x_ref, w4h_ref, b4_ref,
                         wh_ref, bh_ref,
                         out_ref, *, tsdf_scale):
    x = x_ref[...]                                       # (TN, 2F*P) lane-dense

    def mm(a, w_ref):
        return jnp.dot(a, w_ref[...], preferred_element_type=jnp.float32)

    # DenseNet block with host-side-split, block-diagonal weights
    # (no in-kernel concatenates):
    #   relu(cat([x, h]) @ W + b) == relu(x @ Wx + h @ Wh + b),  per packed query.
    x1 = jnp.maximum(mm(x, w1_ref) + b1_ref[...], 0.0)                     # 32*P
    x2 = jnp.maximum(mm(x, w2x_ref) + mm(x1, w2h_ref) + b2_ref[...], 0.0)  # 16*P
    x3 = jnp.maximum(mm(x, w3x_ref) + mm(x2, w3h_ref) + b3_ref[...], 0.0)  #  8*P
    x4 = jnp.maximum(mm(x, w4x_ref) + mm(x3, w4h_ref) + b4_ref[...], 0.0)  #  8*P

    # Fused heads: even cols = tsdf, odd cols = occupancy.  Even-column weights
    # are pre-scaled by 2 host-side so one sigmoid serves both:
    #   tanh(z) = 2*sigmoid(2z) - 1.
    h = mm(x4, wh_ref) + bh_ref[...]                     # (TN, 2*P)
    s = jax.nn.sigmoid(h)                                # single EUP pass
    col = jax.lax.broadcasted_iota(jnp.int32, h.shape, 1)
    out_ref[...] = jnp.where(col % 2 == 0,
                             tsdf_scale * (2.0 * s - 1.0),
                             s)


def translate_mlp_pallas(x, mlp_params, tsdf_scale, pack, tile_queries=8192):
    """x: (N, 2F) float32 -> (tsdf (N,1), occ (N,1))."""
    n, two_f = x.shape
    d = two_f * pack                                     # 128 (P=8) / 256 (P=16)

    # --- row packing + tile sizing -------------------------------------------
    rows = -(-n // pack)
    rows8 = ((rows + 7) // 8) * 8                        # sublane alignment
    tile_rows = max(8, (tile_queries // pack // 8) * 8)  # big tiles amortize the
    tn = min(tile_rows, rows8)                           # ~0.35us/grid-step cost
    if rows8 >= 16:                                      # >=2 steps for v7x's 2 TCs
        tn = min(tn, ((rows8 // 2 + 7) // 8) * 8)
    rows_pad = -(-rows8 // tn) * tn
    n_q_pad = rows_pad * pack
    if n_q_pad != n:
        x = jnp.pad(x, ((0, n_q_pad - n), (0, 0)))       # zero pad -> finite tail
    xp = x.reshape(rows_pad, d)                          # free row-major reshape

    weight_names = ("w1", "b1", "w2x", "w2h", "b2", "w3x", "w3h", "b3",
                    "w4x", "w4h", "b4", "wh", "bh")
    weights = [mlp_params[k] for k in weight_names]

    row_spec = pl.BlockSpec((tn, d), lambda i: (i, 0))
    out_spec = pl.BlockSpec((tn, 2 * pack), lambda i: (i, 0))
    # TODO(synk): the 13 resident weight/bias operands could be packed into one
    # padded VMEM slab to shave DMA descriptors; kept separate for clarity.
    w_specs = [pl.BlockSpec(w.shape, lambda i: (0, 0)) for w in weights]

    out = pl.pallas_call(
        functools.partial(translate_mlp_kernel, tsdf_scale=tsdf_scale),
        out_shape=jax.ShapeDtypeStruct((rows_pad, 2 * pack), jnp.float32),
        grid=(rows_pad // tn,),
        in_specs=[row_spec] + w_specs,
        out_specs=out_spec,
        compiler_params=pltpu.CompilerParams(
            dimension_semantics=("parallel",)),
    )(xp, *weights)

    flat = out.reshape(n_q_pad, 2)[:n]                   # unpack + drop padding
    return flat[:, 0:1], flat[:, 1:2]


# ----------------------- full Translator forward -----------------------------
def translator_forward(query_indices, query_points, feature_volume,
                       count_volume, params, cfg, pack=None, tile_queries=8192):
    del query_points, count_volume  # unused by the reference forward math
    if pack is None:
        pack = _default_pack()
    lin_vol = fold_interpolator_linear(feature_volume, params["wlin"],
                                       params["blin"], cfg.radius)
    x = build_mlp_input(query_indices, feature_volume, lin_vol)
    mlp_params = prepare_mlp_params(params, cfg.len_feature, pack)
    return translate_mlp_pallas(x, mlp_params, cfg.tsdf_scale, pack,
                                tile_queries=tile_queries)


# --------------------------- parameters --------------------------------------
def init_params(key, cfg):
    f = cfg.len_feature
    k = (2 * cfg.radius + 1) ** 3
    out_channels = [32, 16, 8, 8]
    dims = [
        ("wlin", "blin", k * f, f),
        ("w1", "b1", 2 * f, out_channels[0]),
        ("w2", "b2", out_channels[0] + 2 * f, out_channels[1]),
        ("w3", "b3", out_channels[1] + 2 * f, out_channels[2]),
        ("w4", "b4", out_channels[2] + 2 * f, out_channels[3]),
        ("wt", "bt", out_channels[3], 1),
        ("wo", "bo", out_channels[3], 1),
    ]
    params = {}
    for wn, bn, d_in, d_out in dims:
        key, kw, kb = jax.random.split(key, 3)
        # weights stored (in, out); PyTorch Linear is y = x @ W.T + b
        params[wn] = jax.random.normal(kw, (d_in, d_out), jnp.float32) * 0.1
        params[bn] = jax.random.normal(kb, (1, d_out), jnp.float32) * 0.1
    return params


def prepare_mlp_params(p, len_feature, pack):
    """Split DenseNet weights (x-part / prev-layer part), fuse the heads, and
    build block-diagonal P-query-packed copies (kron(eye(P), W)) so the kernel
    runs lane-dense.  Even head columns pre-scaled by 2 for the sigmoid-only
    tanh identity."""
    two_f = 2 * len_feature

    def bd(w):                                   # P copies along the diagonal
        return jnp.kron(jnp.eye(pack, dtype=w.dtype), w)

    def tile_b(b):                               # bias repeated per packed query
        return jnp.tile(b, (1, pack))

    head_scale = jnp.array([[2.0, 1.0]], jnp.float32)          # tanh via sigmoid
    wh = jnp.concatenate([p["wt"], p["wo"]], axis=1) * head_scale   # (8, 2)
    bh = jnp.concatenate([p["bt"], p["bo"]], axis=1) * head_scale   # (1, 2)

    return {
        "w1": bd(p["w1"]), "b1": tile_b(p["b1"]),
        "w2x": bd(p["w2"][:two_f]), "w2h": bd(p["w2"][two_f:]), "b2": tile_b(p["b2"]),
        "w3x": bd(p["w3"][:two_f]), "w3h": bd(p["w3"][two_f:]), "b3": tile_b(p["b3"]),
        "w4x": bd(p["w4"][:two_f]), "w4h": bd(p["w4"][two_f:]), "b4": tile_b(p["b4"]),
        "wh": bd(wh), "bh": tile_b(bh),
    }


# ------------------------- pure-JAX reference --------------------------------
def translator_ref(query_indices, feature_volume, p, radius, tsdf_scale):
    """Original (un-folded, concat-based) math for validation."""
    qi = query_indices.reshape(-1, 3).astype(jnp.int32)
    shifts = index_shift(radius)
    neigh = qi[:, None, :] + shifts[None, :, :] + radius
    padded = jnp.pad(feature_volume, ((radius, radius),) * 3 + ((0, 0),))
    gathered = padded[neigh[..., 0], neigh[..., 1], neigh[..., 2]]
    gathered = gathered.reshape(qi.shape[0], -1).astype(jnp.float32)
    lin = jnp.dot(gathered, p["wlin"],
                  precision=jax.lax.Precision.HIGHEST) + p["blin"]
    qfeat = feature_volume[qi[:, 0], qi[:, 1], qi[:, 2]].astype(jnp.float32)
    x = jnp.concatenate([qfeat, lin], axis=-1)
    x1 = jnp.maximum(x @ p["w1"] + p["b1"], 0.0)
    x2 = jnp.maximum(jnp.concatenate([x, x1], -1) @ p["w2"] + p["b2"], 0.0)
    x3 = jnp.maximum(jnp.concatenate([x, x2], -1) @ p["w3"] + p["b3"], 0.0)
    x4 = jnp.maximum(jnp.concatenate([x, x3], -1) @ p["w4"] + p["b4"], 0.0)
    tsdf = tsdf_scale * jnp.tanh(x4 @ p["wt"] + p["bt"])
    occ = jax.nn.sigmoid(x4 @ p["wo"] + p["bo"])
    return tsdf, occ


# --------------------------------- main --------------------------------------
if __name__ == "__main__":
    cfg = Config()
    key = jax.random.PRNGKey(0)
    k_params, k_vol, k_idx, k_pts = jax.random.split(key, 4)

    params = init_params(k_params, cfg)

    xs = ys = zs = 8
    n1 = n2 = n3 = 4
    feature_volume = jax.random.normal(k_vol, (xs, ys, zs, cfg.len_feature),
                                       jnp.float32)
    count_volume = jnp.ones((xs, ys, zs), jnp.float32)   # unused by forward math
    query_indices = jax.random.randint(k_idx, (n1, n2, n3, 3), 0, xs,
                                       dtype=jnp.int32)
    query_points = jax.random.normal(k_pts, (n1, n2, n3, 3), jnp.float32)

    tsdf, occ = translator_forward(query_indices, query_points, feature_volume,
                                   count_volume, params, cfg)
    jax.block_until_ready((tsdf, occ))

    # sanity check against the original (un-folded) pure-JAX reference
    tsdf_ref, occ_ref = translator_ref(query_indices, feature_volume, params,
                                       cfg.radius, cfg.tsdf_scale)
    assert tsdf.shape == (n1 * n2 * n3, 1) and occ.shape == (n1 * n2 * n3, 1)
    assert jnp.allclose(tsdf, tsdf_ref, atol=2e-4), "tsdf mismatch"
    assert jnp.allclose(occ, occ_ref, atol=2e-4), "occupancy mismatch"

    print("KERNEL_OK")
</pallas_src>

<mosaic_0001>
module attributes {stable_mosaic.version = 11 : i64} {
  func.func @translate_mlp_kernel(%arg0: i32, %arg1: memref<8x128xf32, #tpu.memory_space<vmem>>, %arg2: memref<128x256xf32, #tpu.memory_space<vmem>>, %arg3: memref<1x256xf32, #tpu.memory_space<vmem>>, %arg4: memref<128x128xf32, #tpu.memory_space<vmem>>, %arg5: memref<256x128xf32, #tpu.memory_space<vmem>>, %arg6: memref<1x128xf32, #tpu.memory_space<vmem>>, %arg7: memref<128x64xf32, #tpu.memory_space<vmem>>, %arg8: memref<128x64xf32, #tpu.memory_space<vmem>>, %arg9: memref<1x64xf32, #tpu.memory_space<vmem>>, %arg10: memref<128x64xf32, #tpu.memory_space<vmem>>, %arg11: memref<64x64xf32, #tpu.memory_space<vmem>>, %arg12: memref<1x64xf32, #tpu.memory_space<vmem>>, %arg13: memref<64x16xf32, #tpu.memory_space<vmem>>, %arg14: memref<1x16xf32, #tpu.memory_space<vmem>>, %arg15: memref<8x16xf32, #tpu.memory_space<vmem>>) attributes {dimension_semantics = [#tpu.dimension_semantics<parallel>], iteration_bounds = array<i64: 1>, scalar_prefetch = 0 : i64, scratch_operands = 0 : i64, tpu.core_type = #tpu.core_type<tc>, window_params = [{transform_indices = @transform_0, window_bounds = array<i64: 8, 128>}, {pipeline_mode = #tpu.pipeline_mode<synchronous>, transform_indices = @transform_1, window_bounds = array<i64: 128, 256>}, {pipeline_mode = #tpu.pipeline_mode<synchronous>, transform_indices = @transform_2, window_bounds = array<i64: 1, 256>}, {pipeline_mode = #tpu.pipeline_mode<synchronous>, transform_indices = @transform_3, window_bounds = array<i64: 128, 128>}, {pipeline_mode = #tpu.pipeline_mode<synchronous>, transform_indices = @transform_4, window_bounds = array<i64: 256, 128>}, {pipeline_mode = #tpu.pipeline_mode<synchronous>, transform_indices = @transform_5, window_bounds = array<i64: 1, 128>}, {pipeline_mode = #tpu.pipeline_mode<synchronous>, transform_indices = @transform_6, window_bounds = array<i64: 128, 64>}, {pipeline_mode = #tpu.pipeline_mode<synchronous>, transform_indices = @transform_7, window_bounds = array<i64: 128, 64>}, {pipeline_mode = #tpu.pipeline_mode<synchronous>, transform_indices = @transform_8, window_bounds = array<i64: 1, 64>}, {pipeline_mode = #tpu.pipeline_mode<synchronous>, transform_indices = @transform_9, window_bounds = array<i64: 128, 64>}, {pipeline_mode = #tpu.pipeline_mode<synchronous>, transform_indices = @transform_10, window_bounds = array<i64: 64, 64>}, {pipeline_mode = #tpu.pipeline_mode<synchronous>, transform_indices = @transform_11, window_bounds = array<i64: 1, 64>}, {pipeline_mode = #tpu.pipeline_mode<synchronous>, transform_indices = @transform_12, window_bounds = array<i64: 64, 16>}, {pipeline_mode = #tpu.pipeline_mode<synchronous>, transform_indices = @transform_13, window_bounds = array<i64: 1, 16>}, {transform_indices = @transform_14, window_bounds = array<i64: 8, 16>}]} {
    %c0 = arith.constant 0 : index
    %c0_0 = arith.constant 0 : index
    %0 = vector.load %arg1[%c0, %c0_0] : memref<8x128xf32, #tpu.memory_space<vmem>>, vector<8x128xf32>
    %c0_1 = arith.constant 0 : index
    %c0_2 = arith.constant 0 : index
    %1 = vector.load %arg2[%c0_1, %c0_2] : memref<128x256xf32, #tpu.memory_space<vmem>>, vector<128x256xf32>
    %cst = arith.constant dense<0.000000e+00> : vector<8x256xf32>
    %2 = tpu.matmul %0, %1, %cst {dimension_numbers = #tpu.dot_dimension_numbers<[1], [0], [0], [1], [0, 0, 1, 1], [], []>} : vector<8x128xf32>, vector<128x256xf32>, vector<8x256xf32> -> vector<8x256xf32>
    %c0_3 = arith.constant 0 : index
    %c0_4 = arith.constant 0 : index
    %3 = vector.load %arg3[%c0_3, %c0_4] : memref<1x256xf32, #tpu.memory_space<vmem>>, vector<1x256xf32>
    %4 = vector.broadcast %3 : vector<1x256xf32> to vector<8x256xf32>
    %5 = arith.addf %2, %4 : vector<8x256xf32>
    %cst_5 = arith.constant 0.000000e+00 : f32
    %6 = vector.broadcast %cst_5 : f32 to vector<8x256xf32>
    %7 = arith.maximumf %5, %6 : vector<8x256xf32>
    %c0_6 = arith.constant 0 : index
    %c0_7 = arith.constant 0 : index
    %8 = vector.load %arg4[%c0_6, %c0_7] : memref<128x128xf32, #tpu.memory_space<vmem>>, vector<128x128xf32>
    %cst_8 = arith.constant dense<0.000000e+00> : vector<8x128xf32>
    %9 = tpu.matmul %0, %8, %cst_8 {dimension_numbers = #tpu.dot_dimension_numbers<[1], [0], [0], [1], [0, 0, 1, 1], [], []>} : vector<8x128xf32>, vector<128x128xf32>, vector<8x128xf32> -> vector<8x128xf32>
    %c0_9 = arith.constant 0 : index
    %c0_10 = arith.constant 0 : index
    %10 = vector.load %arg5[%c0_9, %c0_10] : memref<256x128xf32, #tpu.memory_space<vmem>>, vector<256x128xf32>
    %cst_11 = arith.constant dense<0.000000e+00> : vector<8x128xf32>
    %11 = tpu.matmul %7, %10, %cst_11 {dimension_numbers = #tpu.dot_dimension_numbers<[1], [0], [0], [1], [0, 0, 1, 1], [], []>} : vector<8x256xf32>, vector<256x128xf32>, vector<8x128xf32> -> vector<8x128xf32>
    %12 = arith.addf %9, %11 : vector<8x128xf32>
    %c0_12 = arith.constant 0 : index
    %c0_13 = arith.constant 0 : index
    %13 = vector.load %arg6[%c0_12, %c0_13] : memref<1x128xf32, #tpu.memory_space<vmem>>, vector<1x128xf32>
    %14 = vector.broadcast %13 : vector<1x128xf32> to vector<8x128xf32>
    %15 = arith.addf %12, %14 : vector<8x128xf32>
    %cst_14 = arith.constant 0.000000e+00 : f32
    %16 = vector.broadcast %cst_14 : f32 to vector<8x128xf32>
    %17 = arith.maximumf %15, %16 : vector<8x128xf32>
    %c0_15 = arith.constant 0 : index
    %c0_16 = arith.constant 0 : index
    %18 = vector.load %arg7[%c0_15, %c0_16] : memref<128x64xf32, #tpu.memory_space<vmem>>, vector<128x64xf32>
    %cst_17 = arith.constant dense<0.000000e+00> : vector<8x64xf32>
    %19 = tpu.matmul %0, %18, %cst_17 {dimension_numbers = #tpu.dot_dimension_numbers<[1], [0], [0], [1], [0, 0, 1, 1], [], []>} : vector<8x128xf32>, vector<128x64xf32>, vector<8x64xf32> -> vector<8x64xf32>
    %c0_18 = arith.constant 0 : index
    %c0_19 = arith.constant 0 : index
    %20 = vector.load %arg8[%c0_18, %c0_19] : memref<128x64xf32, #tpu.memory_space<vmem>>, vector<128x64xf32>
    %cst_20 = arith.constant dense<0.000000e+00> : vector<8x64xf32>
    %21 = tpu.matmul %17, %20, %cst_20 {dimension_numbers = #tpu.dot_dimension_numbers<[1], [0], [0], [1], [0, 0, 1, 1], [], []>} : vector<8x128xf32>, vector<128x64xf32>, vector<8x64xf32> -> vector<8x64xf32>
    %22 = arith.addf %19, %21 : vector<8x64xf32>
    %c0_21 = arith.constant 0 : index
    %c0_22 = arith.constant 0 : index
    %23 = vector.load %arg9[%c0_21, %c0_22] : memref<1x64xf32, #tpu.memory_space<vmem>>, vector<1x64xf32>
    %24 = vector.broadcast %23 : vector<1x64xf32> to vector<8x64xf32>
    %25 = arith.addf %22, %24 : vector<8x64xf32>
    %cst_23 = arith.constant 0.000000e+00 : f32
    %26 = vector.broadcast %cst_23 : f32 to vector<8x64xf32>
    %27 = arith.maximumf %25, %26 : vector<8x64xf32>
    %c0_24 = arith.constant 0 : index
    %c0_25 = arith.constant 0 : index
    %28 = vector.load %arg10[%c0_24, %c0_25] : memref<128x64xf32, #tpu.memory_space<vmem>>, vector<128x64xf32>
    %cst_26 = arith.constant dense<0.000000e+00> : vector<8x64xf32>
    %29 = tpu.matmul %0, %28, %cst_26 {dimension_numbers = #tpu.dot_dimension_numbers<[1], [0], [0], [1], [0, 0, 1, 1], [], []>} : vector<8x128xf32>, vector<128x64xf32>, vector<8x64xf32> -> vector<8x64xf32>
    %c0_27 = arith.constant 0 : index
    %c0_28 = arith.constant 0 : index
    %30 = vector.load %arg11[%c0_27, %c0_28] : memref<64x64xf32, #tpu.memory_space<vmem>>, vector<64x64xf32>
    %cst_29 = arith.constant dense<0.000000e+00> : vector<8x64xf32>
    %31 = tpu.matmul %27, %30, %cst_29 {dimension_numbers = #tpu.dot_dimension_numbers<[1], [0], [0], [1], [0, 0, 1, 1], [], []>} : vector<8x64xf32>, vector<64x64xf32>, vector<8x64xf32> -> vector<8x64xf32>
    %32 = arith.addf %29, %31 : vector<8x64xf32>
    %c0_30 = arith.constant 0 : index
    %c0_31 = arith.constant 0 : index
    %33 = vector.load %arg12[%c0_30, %c0_31] : memref<1x64xf32, #tpu.memory_space<vmem>>, vector<1x64xf32>
    %34 = vector.broadcast %33 : vector<1x64xf32> to vector<8x64xf32>
    %35 = arith.addf %32, %34 : vector<8x64xf32>
    %cst_32 = arith.constant 0.000000e+00 : f32
    %36 = vector.broadcast %cst_32 : f32 to vector<8x64xf32>
    %37 = arith.maximumf %35, %36 : vector<8x64xf32>
    %c0_33 = arith.constant 0 : index
    %c0_34 = arith.constant 0 : index
    %38 = vector.load %arg13[%c0_33, %c0_34] : memref<64x16xf32, #tpu.memory_space<vmem>>, vector<64x16xf32>
    %cst_35 = arith.constant dense<0.000000e+00> : vector<8x16xf32>
    %39 = tpu.matmul %37, %38, %cst_35 {dimension_numbers = #tpu.dot_dimension_numbers<[1], [0], [0], [1], [0, 0, 1, 1], [], []>} : vector<8x64xf32>, vector<64x16xf32>, vector<8x16xf32> -> vector<8x16xf32>
    %c0_36 = arith.constant 0 : index
    %c0_37 = arith.constant 0 : index
    %40 = vector.load %arg14[%c0_36, %c0_37] : memref<1x16xf32, #tpu.memory_space<vmem>>, vector<1x16xf32>
    %41 = vector.broadcast %40 : vector<1x16xf32> to vector<8x16xf32>
    %42 = arith.addf %39, %41 : vector<8x16xf32>
    %43 = arith.negf %42 : vector<8x16xf32>
    %44 = math.exp %43 : vector<8x16xf32>
    %cst_38 = arith.constant 1.000000e+00 : f32
    %45 = vector.broadcast %cst_38 : f32 to vector<8x16xf32>
    %46 = arith.addf %45, %44 : vector<8x16xf32>
    %47 = arith.divf %45, %46 : vector<8x16xf32>
    %48 = tpu.iota {dimensions = array<i32: 1>} : vector<8x16xi32>
    %c2_i32 = arith.constant 2 : i32
    %c0_i32 = arith.constant 0 : i32
    %49 = arith.cmpi eq, %c2_i32, %c0_i32 : i32
    %c1_i32 = arith.constant 1 : i32
    %50 = arith.select %49, %c1_i32, %c2_i32 : i32
    %51 = vector.broadcast %50 : i32 to vector<8x16xi32>
    %52 = arith.remsi %48, %51 : vector<8x16xi32>
    %c0_i32_39 = arith.constant 0 : i32
    %53 = vector.broadcast %c0_i32_39 : i32 to vector<8x16xi32>
    %54 = arith.cmpi ne, %52, %53 : vector<8x16xi32>
    %c0_i32_40 = arith.constant 0 : i32
    %55 = vector.broadcast %c0_i32_40 : i32 to vector<8x16xi32>
    %56 = arith.cmpi slt, %52, %55 : vector<8x16xi32>
    %c0_i32_41 = arith.constant 0 : i32
    %57 = arith.cmpi slt, %50, %c0_i32_41 : i32
    %58 = vector.broadcast %57 : i1 to vector<8x16xi1>
    %59 = vector.broadcast %58 : vector<8x16xi1> to vector<8x16xi1>
    %60 = arith.xori %56, %59 : vector<8x16xi1>
    %61 = arith.andi %60, %54 : vector<8x16xi1>
    %62 = vector.broadcast %50 : i32 to vector<8x16xi32>
    %63 = arith.addi %52, %62 : vector<8x16xi32>
    %64 = arith.select %61, %63, %52 : vector<8x16xi1>, vector<8x16xi32>
    %c0_i32_42 = arith.constant 0 : i32
    %65 = vector.broadcast %c0_i32_42 : i32 to vector<8x16xi32>
    %66 = arith.cmpi eq, %64, %65 : vector<8x16xi32>
    %cst_43 = arith.constant 2.000000e+00 : f32
    %67 = vector.broadcast %cst_43 : f32 to vector<8x16xf32>
    %68 = arith.mulf %67, %47 : vector<8x16xf32>
    %cst_44 = arith.constant 1.000000e+00 : f32
    %69 = vector.broadcast %cst_44 : f32 to vector<8x16xf32>
    %70 = arith.subf %68, %69 : vector<8x16xf32>
    %cst_45 = arith.constant 1.000000e+00 : f32
    %71 = vector.broadcast %cst_45 : f32 to vector<8x16xf32>
    %72 = arith.mulf %71, %70 : vector<8x16xf32>
    %73 = arith.select %66, %72, %47 : vector<8x16xi1>, vector<8x16xf32>
    %c0_46 = arith.constant 0 : index
    %c0_47 = arith.constant 0 : index
    %74 = vector.load %arg15[%c0_46, %c0_47] : memref<8x16xf32, #tpu.memory_space<vmem>>, vector<8x16xf32>
    tpu.vector_store %arg15[%c0_46, %c0_47], %73 {strides = array<i32>} : memref<8x16xf32, #tpu.memory_space<vmem>>, vector<8x16xf32>,
    return
  }
  func.func @transform_0(%arg0: i32) -> (i32, i32) {
    %c0_i32 = arith.constant 0 : i32
    %c0_i32_0 = arith.constant 0 : i32
    return %arg0, %c0_i32 : i32, i32
  }
  func.func @transform_1(%arg0: i32) -> (i32, i32) {
    %c0_i32 = arith.constant 0 : i32
    %c0_i32_0 = arith.constant 0 : i32
    %c0_i32_1 = arith.constant 0 : i32
    return %c0_i32, %c0_i32_0 : i32, i32
  }
  func.func @transform_2(%arg0: i32) -> (i32, i32) {
    %c0_i32 = arith.constant 0 : i32
    %c0_i32_0 = arith.constant 0 : i32
    %c0_i32_1 = arith.constant 0 : i32
    return %c0_i32, %c0_i32_0 : i32, i32
  }
  func.func @transform_3(%arg0: i32) -> (i32, i32) {
    %c0_i32 = arith.constant 0 : i32
    %c0_i32_0 = arith.constant 0 : i32
    %c0_i32_1 = arith.constant 0 : i32
    return %c0_i32, %c0_i32_0 : i32, i32
  }
  func.func @transform_4(%arg0: i32) -> (i32, i32) {
    %c0_i32 = arith.constant 0 : i32
    %c0_i32_0 = arith.constant 0 : i32
    %c0_i32_1 = arith.constant 0 : i32
    return %c0_i32, %c0_i32_0 : i32, i32
  }
  func.func @transform_5(%arg0: i32) -> (i32, i32) {
    %c0_i32 = arith.constant 0 : i32
    %c0_i32_0 = arith.constant 0 : i32
    %c0_i32_1 = arith.constant 0 : i32
    return %c0_i32, %c0_i32_0 : i32, i32
  }
  func.func @transform_6(%arg0: i32) -> (i32, i32) {
    %c0_i32 = arith.constant 0 : i32
    %c0_i32_0 = arith.constant 0 : i32
    %c0_i32_1 = arith.constant 0 : i32
    return %c0_i32, %c0_i32_0 : i32, i32
  }
  func.func @transform_7(%arg0: i32) -> (i32, i32) {
    %c0_i32 = arith.constant 0 : i32
    %c0_i32_0 = arith.constant 0 : i32
    %c0_i32_1 = arith.constant 0 : i32
    return %c0_i32, %c0_i32_0 : i32, i32
  }
  func.func @transform_8(%arg0: i32) -> (i32, i32) {
    %c0_i32 = arith.constant 0 : i32
    %c0_i32_0 = arith.constant 0 : i32
    %c0_i32_1 = arith.constant 0 : i32
    return %c0_i32, %c0_i32_0 : i32, i32
  }
  func.func @transform_9(%arg0: i32) -> (i32, i32) {
    %c0_i32 = arith.constant 0 : i32
    %c0_i32_0 = arith.constant 0 : i32
    %c0_i32_1 = arith.constant 0 : i32
    return %c0_i32, %c0_i32_0 : i32, i32
  }
  func.func @transform_10(%arg0: i32) -> (i32, i32) {
    %c0_i32 = arith.constant 0 : i32
    %c0_i32_0 = arith.constant 0 : i32
    %c0_i32_1 = arith.constant 0 : i32
    return %c0_i32, %c0_i32_0 : i32, i32
  }
  func.func @transform_11(%arg0: i32) -> (i32, i32) {
    %c0_i32 = arith.constant 0 : i32
    %c0_i32_0 = arith.constant 0 : i32
    %c0_i32_1 = arith.constant 0 : i32
    return %c0_i32, %c0_i32_0 : i32, i32
  }
  func.func @transform_12(%arg0: i32) -> (i32, i32) {
    %c0_i32 = arith.constant 0 : i32
    %c0_i32_0 = arith.constant 0 : i32
    %c0_i32_1 = arith.constant 0 : i32
    return %c0_i32, %c0_i32_0 : i32, i32
  }
  func.func @transform_13(%arg0: i32) -> (i32, i32) {
    %c0_i32 = arith.constant 0 : i32
    %c0_i32_0 = arith.constant 0 : i32
    %c0_i32_1 = arith.constant 0 : i32
    return %c0_i32, %c0_i32_0 : i32, i32
  }
  func.func @transform_14(%arg0: i32) -> (i32, i32) {
    %c0_i32 = arith.constant 0 : i32
    %c0_i32_0 = arith.constant 0 : i32
    return %arg0, %c0_i32 : i32, i32
  }
}

</mosaic_0001>

<bundles_post_ra>
// kernel: tpu_custom_call.1
= control target key start
LH: loop header
LB: loop body
LE: loop exit
PB: predicated region body
PF: predicated region fallthrough
CT: control target
= control target key end

     0   :  { %19 = vsyncpa [#allocation3], 0  ;;  %s2009_s0 = inlined_call_operand.vmem [shape: f32[8,128], index: 0, kind: input, shape index: {}]   ;;  %s2010_s1 = inlined_call_operand.vmem [shape: f32[128,256], index: 1, kind: input, shape index: {}]   ;;  %s2011_s2 = inlined_call_operand.vmem [shape: f32[1,256], index: 2, kind: input, shape index: {}]   ;;  %s2012_s3 = inlined_call_operand.vmem [shape: f32[128,128], index: 3, kind: input, shape index: {}]   ;;  %s2013_s4 = inlined_call_operand.vmem [shape: f32[256,128], index: 4, kind: input, shape index: {}]   ;;  %s2014_s5 = inlined_call_operand.vmem [shape: f32[1,128], index: 5, kind: input, shape index: {}]   ;;  %s2015_s6 = inlined_call_operand.vmem [shape: f32[128,64], index: 6, kind: input, shape index: {}]   ;;  %s2016_s7 = inlined_call_operand.vmem [shape: f32[128,64], index: 7, kind: input, shape index: {}]   ;;  %s2017_s8 = inlined_call_operand.vmem [shape: f32[1,64], index: 8, kind: input, shape index: {}]   ;;  %s2018_s9 = inlined_call_operand.vmem [shape: f32[128,64], index: 9, kind: input, shape index: {}]   ;;  %s2019_s10 = inlined_call_operand.hbm [shape: f32[64,64], index: 10, kind: input, shape index: {}]   ;;  %s2020_s11 = inlined_call_operand.vmem [shape: f32[1,64], index: 11, kind: input, shape index: {}]   ;;  %s2021_s12 = inlined_call_operand.vmem [shape: f32[64,16], index: 12, kind: input, shape index: {}]   ;;  %s2022_s13 = inlined_call_operand.vmem [shape: f32[1,16], index: 13, kind: input, shape index: {}]   ;;  %s2023_s14 = inlined_call_operand.hbm [shape: f32[8,16], index: 14, kind: output, shape index: {}]  }
   0x1   :  { %20 = vsyncpa [#allocation4], 0  ;;  %s1414_s29 = smov [#allocation2]   ;;  %s1366_s17 = scalar_lea.hbm %s2019_s10, 1024 }
   0x2   :  { %s46_s30 = sshll.u32 %s1414_s29, 4  ;;  %p1367_p0 = scmp.ne.s32.totalorder %s2019_s10, %s1366_s17  ;;  %s47_s30 = int_to_ptr.vmem [resolvable:$true] %s46_s30 }
   0x3   :  { %p1370_p1 = scmp.lt.u32.totalorder %s1366_s17, %s2019_s10 }
   0x5   :  { %p1372_p2 = pnand %p1370_p1, %p1367_p0 }
   0x7   :  { %1375 = shalt.err (!%p1372_p2)
}
   0x8   :  { %s1376_s22 = scalar_lea.vmem %s47_s30, 1024  ;;  %p1381_p4 = scmp.lt.s32.totalorder %s47_s30, %s47_s30 }
   0x9   :  { %p1377_p3 = scmp.ne.s32.totalorder %s47_s30, %s1376_s22  ;;  %p1382_p5 = scmp.lt.s32.totalorder %s1376_s22, %s1376_s22 }
   0xb   :  { %p1383_p6 = por %p1382_p5, %p1381_p4 }
   0xd   :  { %p1384_p7 = pnand %p1383_p6, %p1377_p3 }
   0xf   :  { %1387 = shalt.err (!%p1384_p7)
}
  0x10   :  { %s1415_s23 = smov 128   ;;  %s1416_s24 = smov 8  }
  0x11   :  { %52 = dma.hbm_to_vmem [thread:$0]  %s2019_s10, 1024, %s47_s30, [#allocation3], %s1415_s23, %s1415_s23, %s1416_s24  }
  0x12   :  { %1410 = dma.done.wait [#allocation3], 1024  }
  0x13   :  { %1411 = vsyncadd [#allocation3], 4294966272  ;;  %v1417_v0 = vmov 0.0   ;;  %v64_v1 = vld [vmem:[%s2010_s1 + $0x8] sm:$0xff]  ;;  %v66_v2 = vld [vmem:[%s2010_s1 + $0x18] sm:$0xff]  ;;  %vm1419_vm0 = vmmov 0  }
  0x14   :  { %171 = vmatprep.mubr.f32.mxu0 %v1417_v0  ;;  %v63_v3 = vld [vmem:[%s2010_s1] sm:$0xff]  ;;  %v1171_v4 = vpack.c.bf16 %v66_v2, %v64_v1  ;;  %v65_v5 = vld [vmem:[%s2010_s1 + $0x10] sm:$0xff]  ;;  %v68_v6 = vld [vmem:[%s2010_s1 + $0x28] sm:$0xff]  ;;  %vm582_vm1 = vcmask 523264   ;;  %vm847_vm3 = vcmask 130048  }
  0x15   :  { %v70_v7 = vld [vmem:[%s2010_s1 + $0x38] sm:$0xff]  ;;  %v1173_v8 = vpack.c.bf16 %v65_v5, %v63_v3  ;;  %v67_v10 = vld [vmem:[%s2010_s1 + $0x20] sm:$0xff]  ;;  %v69_v11 = vld [vmem:[%s2010_s1 + $0x30] sm:$0xff] }
  0x16   :  { %v1175_v9 = vpack.c.bf16 %v70_v7, %v68_v6  ;;  %v72_v12 = vld [vmem:[%s2010_s1 + $0x48] sm:$0xff]  ;;  %1172 = vmatprep.subr.bf16.mxu0 %v1171_v4  ;;  %v74_v13 = vld [vmem:[%s2010_s1 + $0x58] sm:$0xff]  ;;  %v1177_v14 = vpack.c.bf16 %v69_v11, %v67_v10  ;;  %v71_v16 = vld [vmem:[%s2010_s1 + $0x40] sm:$0xff] }
  0x17   :  { %1174 = vmatpush1.bf16.msra.mxu0 %v1173_v8  ;;  %v1179_v15 = vpack.c.bf16 %v74_v13, %v72_v12  ;;  %v73_v17 = vld [vmem:[%s2010_s1 + $0x50] sm:$0xff]  ;;  %v76_v18 = vld [vmem:[%s2010_s1 + $0x68] sm:$0xff]  ;;  %v78_v19 = vld [vmem:[%s2010_s1 + $0x78] sm:$0xff] }
  0x18   :  { %1176 = vmatprep.subr.bf16.mxu0 %v1175_v9  ;;  %v1181_v20 = vpack.c.bf16 %v73_v17, %v71_v16  ;;  %v1183_v21 = vpack.c.bf16 %v78_v19, %v76_v18  ;;  %v75_v22 = vld [vmem:[%s2010_s1 + $0x60] sm:$0xff]  ;;  %v77_v23 = vld [vmem:[%s2010_s1 + $0x70] sm:$0xff]  ;;  %v80_v24 = vld [vmem:[%s2010_s1 + $0x88] sm:$0xff] }
  0x19   :  { %v82_v25 = vld [vmem:[%s2010_s1 + $0x98] sm:$0xff]  ;;  %v212_v26 = vld [vmem:[%s2013_s4 + $0x80] sm:$0xff]  ;;  %v213_v27 = vld [vmem:[%s2013_s4 + $0x88] sm:$0xff]  ;;  %v1185_v29 = vpack.c.bf16 %v77_v23, %v75_v22 }
  0x1a   :  { %v196_v28 = vld [vmem:[%s2013_s4] sm:$0xff]  ;;  %v81_v31 = vld [vmem:[%s2010_s1 + $0x90] sm:$0xff]  ;;  %v1203_v32 = vpack.c.bf16 %v213_v27, %v212_v26  ;;  %v197_v33 = vld [vmem:[%s2013_s4 + $0x8] sm:$0xff]  ;;  %v1187_v34 = vpack.c.bf16 %v82_v25, %v80_v24 }
  0x1b   :  { %1178 = vmatpush1.bf16.msra.mxu0 %v1177_v14  ;;  %v79_v30 = vld [vmem:[%s2010_s1 + $0x80] sm:$0xff]  ;;  %v1205_v35 = vpack.c.bf16 %v197_v33, %v196_v28  ;;  %v214_v36 = vld [vmem:[%s2013_s4 + $0x90] sm:$0xff]  ;;  %v215_v37 = vld [vmem:[%s2013_s4 + $0x98] sm:$0xff] }
  0x1c   :  { %1180 = vmatprep.subr.bf16.mxu0 %v1179_v15  ;;  %v198_v38 = vld [vmem:[%s2013_s4 + $0x10] sm:$0xff]  ;;  %v84_v39 = vld [vmem:[%s2010_s1 + $0xa8] sm:$0xff]  ;;  %v86_v40 = vld [vmem:[%s2010_s1 + $0xb8] sm:$0xff]  ;;  %1204 = vmatprep.subr.bf16.mxu1 %v1203_v32  ;;  %v1207_v41 = vpack.c.bf16 %v215_v37, %v214_v36  ;;  %v1189_v46 = vpack.c.bf16 %v81_v31, %v79_v30 }
  0x1d   :  { %v199_v42 = vld [vmem:[%s2013_s4 + $0x18] sm:$0xff]  ;;  %1206 = vmatpush3.bf16.msra.mxu1 %v1205_v35  ;;  %v216_v44 = vld [vmem:[%s2013_s4 + $0xa0] sm:$0xff]  ;;  %v217_v45 = vld [vmem:[%s2013_s4 + $0xa8] sm:$0xff]  ;;  %v1191_v51 = vpack.c.bf16 %v86_v40, %v84_v39 }
  0x1e   :  { %v1209_v43 = vpack.c.bf16 %v199_v42, %v198_v38  ;;  %v83_v47 = vld [vmem:[%s2010_s1 + $0xa0] sm:$0xff]  ;;  %1208 = vmatprep.subr.bf16.mxu1 %v1207_v41  ;;  %v1211_v48 = vpack.c.bf16 %v217_v45, %v216_v44  ;;  %v201_v50 = vld [vmem:[%s2013_s4 + $0x28] sm:$0xff]  ;;  %v85_v52 = vld [vmem:[%s2010_s1 + $0xb0] sm:$0xff] }
  0x1f   :  { %1182 = vmatpush1.bf16.msra.mxu0 %v1181_v20  ;;  %v200_v49 = vld [vmem:[%s2013_s4 + $0x20] sm:$0xff]  ;;  %v218_v53 = vld [vmem:[%s2013_s4 + $0xb0] sm:$0xff]  ;;  %v219_v54 = vld [vmem:[%s2013_s4 + $0xb8] sm:$0xff]  ;;  %v1193_v58 = vpack.c.bf16 %v85_v52, %v83_v47 }
  0x20   :  { %1184 = vmatprep.subr.bf16.mxu0 %v1183_v21  ;;  %v88_v55 = vld [vmem:[%s2010_s1 + $0xc8] sm:$0xff]  ;;  %v90_v56 = vld [vmem:[%s2010_s1 + $0xd8] sm:$0xff]  ;;  %v1213_v57 = vpack.c.bf16 %v201_v50, %v200_v49  ;;  %v87_v59 = vld [vmem:[%s2010_s1 + $0xc0] sm:$0xff]  ;;  %v1215_v60 = vpack.c.bf16 %v219_v54, %v218_v53 }
  0x21   :  { %1210 = vmatpush3.bf16.msra.mxu1 %v1209_v43  ;;  %v202_v61 = vld [vmem:[%s2013_s4 + $0x30] sm:$0xff]  ;;  %v203_v62 = vld [vmem:[%s2013_s4 + $0x38] sm:$0xff]  ;;  %v1195_v63 = vpack.c.bf16 %v90_v56, %v88_v55  ;;  %v220_v2 = vld [vmem:[%s2013_s4 + $0xc0] sm:$0xff] }
  0x22   :  { %1212 = vmatprep.subr.bf16.mxu1 %v1211_v48  ;;  %v89_v1 = vld [vmem:[%s2010_s1 + $0xd0] sm:$0xff]  ;;  %v221_v3 = vld [vmem:[%s2013_s4 + $0xc8] sm:$0xff]  ;;  %v94_v5 = vld [vmem:[%s2010_s1 + $0xf8] sm:$0xff]  ;;  %v1217_v6 = vpack.c.bf16 %v203_v62, %v202_v61 }
  0x23   :  { %1186 = vmatpush1.bf16.msra.mxu0 %v1185_v29  ;;  %v92_v4 = vld [vmem:[%s2010_s1 + $0xe8] sm:$0xff]  ;;  %v1197_v7 = vpack.c.bf16 %v89_v1, %v87_v59  ;;  %v91_v8 = vld [vmem:[%s2010_s1 + $0xe0] sm:$0xff]  ;;  %v1219_v9 = vpack.c.bf16 %v221_v3, %v220_v2  ;;  %v93_v13 = vld [vmem:[%s2010_s1 + $0xf0] sm:$0xff]  ;;  %v1418_v29 = vmov 0.0|0.0  }
  0x24   :  { %1188 = vmatprep.subr.bf16.mxu0 %v1187_v34  ;;  %v204_v10 = vld [vmem:[%s2013_s4 + $0x40] sm:$0xff]  ;;  %v205_v11 = vld [vmem:[%s2013_s4 + $0x48] sm:$0xff]  ;;  %v1199_v12 = vpack.c.bf16 %v94_v5, %v92_v4  ;;  %v222_v14 = vld [vmem:[%s2013_s4 + $0xd0] sm:$0xff]  ;;  %v1201_v17 = vpack.c.bf16 %v93_v13, %v91_v8 }
  0x25   :  { %1214 = vmatpush3.bf16.msra.mxu1 %v1213_v57  ;;  %v223_v15 = vld [vmem:[%s2013_s4 + $0xd8] sm:$0xff]  ;;  %v1221_v16 = vpack.c.bf16 %v205_v11, %v204_v10  ;;  %v180_v18 = vld [vmem:[%s2012_s3] sm:$0xff]  ;;  %v206_v20 = vld [vmem:[%s2013_s4 + $0x50] sm:$0xff] }
  0x26   :  { %1216 = vmatprep.subr.bf16.mxu1 %v1215_v60  ;;  %v1223_v19 = vpack.c.bf16 %v223_v15, %v222_v14  ;;  %v207_v21 = vld [vmem:[%s2013_s4 + $0x58] sm:$0xff]  ;;  %v181_v22 = vld [vmem:[%s2012_s3 + $0x8] sm:$0xff]  ;;  %v224_v23 = vld [vmem:[%s2013_s4 + $0xe0] sm:$0xff]  ;;  %v97_v15 = vlaneseq }
  0x27   :  { %1190 = vmatpush1.bf16.msra.mxu0 %v1189_v46  ;;  %v225_v24 = vld [vmem:[%s2013_s4 + $0xe8] sm:$0xff]  ;;  %v1225_v25 = vpack.c.bf16 %v207_v21, %v206_v20  ;;  %v1692_v26 = vld [vmem:[%s2009_s0] sm:$0xff]  ;;  %v1236_v27 = vpack.c.bf16 %v181_v22, %v180_v18  ;;  %v182_v30 = vld [vmem:[%s2012_s3 + $0x10] sm:$0xff] }
  0x28   :  { %1192 = vmatprep.subr.bf16.mxu0 %v1191_v51  ;;  %v1227_v28 = vpack.c.bf16 %v225_v24, %v224_v23  ;;  %v183_v31 = vld [vmem:[%s2012_s3 + $0x18] sm:$0xff]  ;;  %v184_v33 = vld [vmem:[%s2012_s3 + $0x20] sm:$0xff]  ;;  %v185_v34 = vld [vmem:[%s2012_s3 + $0x28] sm:$0xff] }
  0x29   :  { %1218 = vmatpush3.bf16.msra.mxu1 %v1217_v6  ;;  %v1239_v32 = vpack.c.bf16 %v183_v31, %v182_v30  ;;  %v1242_v35 = vpack.c.bf16 %v185_v34, %v184_v33  ;;  %v186_v36 = vld [vmem:[%s2012_s3 + $0x30] sm:$0xff]  ;;  %v187_v37 = vld [vmem:[%s2012_s3 + $0x38] sm:$0xff]  ;;  %v188_v39 = vld [vmem:[%s2012_s3 + $0x40] sm:$0xff] }
  0x2a   :  { %1220 = vmatprep.subr.bf16.mxu1 %v1219_v9  ;;  %v1245_v38 = vpack.c.bf16 %v187_v37, %v186_v36  ;;  %v189_v40 = vld [vmem:[%s2012_s3 + $0x48] sm:$0xff]  ;;  %v190_v42 = vld [vmem:[%s2012_s3 + $0x50] sm:$0xff]  ;;  %v191_v43 = vld [vmem:[%s2012_s3 + $0x58] sm:$0xff] }
  0x2b   :  { %1194 = vmatpush1.bf16.msra.mxu0 %v1193_v58  ;;  %v1248_v41 = vpack.c.bf16 %v189_v40, %v188_v39  ;;  %v1251_v44 = vpack.c.bf16 %v191_v43, %v190_v42  ;;  %v208_v45 = vld [vmem:[%s2013_s4 + $0x60] sm:$0xff]  ;;  %v209_v46 = vld [vmem:[%s2013_s4 + $0x68] sm:$0xff]  ;;  %v226_v51 = vld [vmem:[%s2013_s4 + $0xf0] sm:$0xff] }
  0x2c   :  { %1196 = vmatprep.subr.bf16.mxu0 %v1195_v63  ;;  %v1229_v47 = vpack.c.bf16 %v209_v46, %v208_v45  ;;  %v192_v48 = vld [vmem:[%s2012_s3 + $0x60] sm:$0xff]  ;;  %v193_v49 = vld [vmem:[%s2012_s3 + $0x68] sm:$0xff]  ;;  %v227_v52 = vld [vmem:[%s2013_s4 + $0xf8] sm:$0xff] }
  0x2d   :  { %1222 = vmatpush3.bf16.msra.mxu1 %v1221_v16  ;;  %v1254_v50 = vpack.c.bf16 %v193_v49, %v192_v48  ;;  %v1231_v53 = vpack.c.bf16 %v227_v52, %v226_v51  ;;  %v210_v54 = vld [vmem:[%s2013_s4 + $0x70] sm:$0xff]  ;;  %v211_v55 = vld [vmem:[%s2013_s4 + $0x78] sm:$0xff]  ;;  %v377_v60 = vld [vmem:[%s2015_s6] sm:$0xff]  ;;  %v98_v16 = vshrl.u32 %v97_v15, 7 }
  0x2e   :  { %1224 = vmatprep.subr.bf16.mxu1 %v1223_v19  ;;  %v1233_v56 = vpack.c.bf16 %v211_v55, %v210_v54  ;;  %v194_v57 = vld [vmem:[%s2012_s3 + $0x70] sm:$0xff]  ;;  %v195_v58 = vld [vmem:[%s2012_s3 + $0x78] sm:$0xff]  ;;  %v378_v61 = vld [vmem:[%s2015_s6 + $0x8] sm:$0xff] }
  0x2f   :  { %1198 = vmatpush1.bf16.msra.mxu0 %v1197_v7  ;;  %v1257_v59 = vpack.c.bf16 %v195_v58, %v194_v57  ;;  %v1284_v62 = vpack.c.bf16 %v378_v61, %v377_v60  ;;  %v379_v63 = vld [vmem:[%s2015_s6 + $0x10] sm:$0xff]  ;;  %v380_v1 = vld [vmem:[%s2015_s6 + $0x18] sm:$0xff]  ;;  %v381_v3 = vld [vmem:[%s2015_s6 + $0x20] sm:$0xff]  ;;  %v103_v19 = vsub.s32 1, %v98_v16 }
  0x30   :  { %1200 = vmatprep.subr.bf16.mxu0 %v1199_v12  ;;  %v1287_v2 = vpack.c.bf16 %v380_v1, %v379_v63  ;;  %v382_v4 = vld [vmem:[%s2015_s6 + $0x28] sm:$0xff]  ;;  %v383_v6 = vld [vmem:[%s2015_s6 + $0x30] sm:$0xff]  ;;  %v384_v7 = vld [vmem:[%s2015_s6 + $0x38] sm:$0xff] }
  0x31   :  { %1226 = vmatpush3.bf16.msra.mxu1 %v1225_v25  ;;  %v1290_v5 = vpack.c.bf16 %v382_v4, %v381_v3  ;;  %v1293_v8 = vpack.c.bf16 %v384_v7, %v383_v6  ;;  %v385_v9 = vld [vmem:[%s2015_s6 + $0x40] sm:$0xff]  ;;  %v386_v10 = vld [vmem:[%s2015_s6 + $0x48] sm:$0xff]  ;;  %v387_v12 = vld [vmem:[%s2015_s6 + $0x50] sm:$0xff] }
  0x32   :  { %1228 = vmatprep.subr.bf16.mxu1 %v1227_v28  ;;  %v1296_v11 = vpack.c.bf16 %v386_v10, %v385_v9  ;;  %v388_v13 = vld [vmem:[%s2015_s6 + $0x58] sm:$0xff]  ;;  %v95_v18 = vld [vmem:[%s2011_s2] sm:$0x3]  ;;  %v395_v33 = vld [vmem:[%s2016_s7 + $0x10] sm:$0xff] }
  0x33   :  { %1202 = vmatpush1.bf16.msra.mxu0 %v1201_v17  ;;  %v1299_v14 = vpack.c.bf16 %v388_v13, %v387_v12  ;;  %v99_v17 = vsub.s32 0, %v98_v16  ;;  %v104_v21 = vrot.slane %v95_v18, %v103_v19  ;;  %v393_v25 = vld [vmem:[%s2016_s7] sm:$0xff]  ;;  %v396_v34 = vld [vmem:[%s2016_s7 + $0x18] sm:$0xff]  ;;  %v398_v37 = vld [vmem:[%s2016_s7 + $0x28] sm:$0xff] }
  0x34   :  { %1235 = vmatprep.subr.bf16.mxu0 %v1418_v29  ;;  %v397_v36 = vld [vmem:[%s2016_s7 + $0x20] sm:$0xff]  ;;  %v399_v39 = vld [vmem:[%s2016_s7 + $0x30] sm:$0xff]  ;;  %v400_v40 = vld [vmem:[%s2016_s7 + $0x38] sm:$0xff] }
  0x35   :  { %1230 = vmatpush3.bf16.msra.mxu1 %v1229_v47  ;;  %v100_v20 = vrot.slane %v95_v18, %v99_v17  ;;  %v401_v42 = vld [vmem:[%s2016_s7 + $0x40] sm:$0xff]  ;;  %v402_v43 = vld [vmem:[%s2016_s7 + $0x48] sm:$0xff]  ;;  %v403_v45 = vld [vmem:[%s2016_s7 + $0x50] sm:$0xff] }
  0x36   :  { %172 = vmatmul.mubr.f32.vlgmr.msra.gmra.mrb[0].mxu0 %v1692_v26  ;;  %1232 = vmatprep.subr.bf16.mxu1 %v1231_v53  ;;  %v404_v46 = vld [vmem:[%s2016_s7 + $0x58] sm:$0xff]  ;;  %v389_v48 = vld [vmem:[%s2015_s6 + $0x60] sm:$0xff]  ;;  %v390_v49 = vld [vmem:[%s2015_s6 + $0x68] sm:$0xff] }
  0x37   :  { %1237 = vmatpush3.bf16.msra.mxu0 %v1236_v27  ;;  %1025 = vmatprep.mubr.msk.f32.mxu0 %vm1419_vm0, %v1417_v0  ;;  %v394_v27 = vld [vmem:[%s2016_s7 + $0x8] sm:$0xff]  ;;  %v1275_v47 = vpack.c.bf16 %v404_v46, %v403_v45  ;;  %v405_v51 = vld [vmem:[%s2016_s7 + $0x60] sm:$0xff]  ;;  %v392_v57 = vld [vmem:[%s2015_s6 + $0x78] sm:$0xff] }
  0x38   :  { %1238 = vmatprep.subr.bf16.mxu0 %v1418_v29  ;;  %v1260_v31 = vpack.c.bf16 %v394_v27, %v393_v25  ;;  %v406_v52 = vld [vmem:[%s2016_s7 + $0x68] sm:$0xff]  ;;  %v408_v60 = vld [vmem:[%s2016_s7 + $0x78] sm:$0xff]  ;;  %v574_v4 = vld [vmem:[#allocation2] sm:$0xff] }
  0x39   :  { %1234 = vmatpush3.bf16.msra.mxu1 %v1233_v56  ;;  %v1278_v53 = vpack.c.bf16 %v406_v52, %v405_v51  ;;  %v391_v56 = vld [vmem:[%s2015_s6 + $0x70] sm:$0xff]  ;;  %v577_v10 = vld [vmem:[#allocation2 + $0x18] sm:$0xff]  ;;  %v578_v12 = vld [vmem:[#allocation2 + $0x20] sm:$0xff] }
  0x3a   :  { %1259 = vmatprep.subr.bf16.mxu1 %v1418_v29  ;;  %v1305_v58 = vpack.c.bf16 %v392_v57, %v391_v56  ;;  %v576_v9 = vld [vmem:[#allocation2 + $0x10] sm:$0xff]  ;;  %v579_v13 = vld [vmem:[#allocation2 + $0x28] sm:$0xff]  ;;  %v581_v19 = vld [vmem:[#allocation2 + $0x38] sm:$0xff] }
  0x3b   :  { %1240 = vmatpush3.bf16.msra.mxu0 %v1239_v32  ;;  %v580_v18 = vld [vmem:[#allocation2 + $0x30] sm:$0xff]  ;;  %v558_v25 = vld [vmem:[%s2018_s9] sm:$0xff]  ;;  %v559_v27 = vld [vmem:[%s2018_s9 + $0x8] sm:$0xff] }
  0x3c   :  { %1241 = vmatprep.subr.bf16.mxu0 %v1418_v29  ;;  %v570_v46 = vld [vmem:[%s2018_s9 + $0x60] sm:$0xff]  ;;  %v738_v56 = vld [vmem:[%s2021_s12 + $0x18] sm:$0xff] }
  0x3d   :  { %v735_v52 = vld [vmem:[%s2021_s12] sm:$0xff] }
  0x3f   :  { %1243 = vmatpush3.bf16.msra.mxu0 %v1242_v35  ;;  %v1263_v35 = vpack.c.bf16 %v396_v34, %v395_v33  ;;  %v561_v33 = vld [vmem:[%s2018_s9 + $0x18] sm:$0xff] }
  0x40   :  { %1244 = vmatprep.subr.bf16.mxu0 %v1418_v29 }
  0x43   :  { %1246 = vmatpush3.bf16.msra.mxu0 %v1245_v38  ;;  %v1266_v38 = vpack.c.bf16 %v398_v37, %v397_v36  ;;  %v563_v36 = vld [vmem:[%s2018_s9 + $0x28] sm:$0xff] }
  0x44   :  { %1247 = vmatprep.subr.bf16.mxu0 %v1418_v29 }
  0x47   :  { %1249 = vmatpush3.bf16.msra.mxu0 %v1248_v41  ;;  %v1269_v41 = vpack.c.bf16 %v400_v40, %v399_v39  ;;  %v566_v40 = vld [vmem:[%s2018_s9 + $0x40] sm:$0xff] }
  0x48   :  { %1250 = vmatprep.subr.bf16.mxu0 %v1418_v29 }
  0x4b   :  { %1252 = vmatpush3.bf16.msra.mxu0 %v1251_v44  ;;  %v1272_v44 = vpack.c.bf16 %v402_v43, %v401_v42  ;;  %v568_v43 = vld [vmem:[%s2018_s9 + $0x50] sm:$0xff] }
  0x4c   :  { %1253 = vmatprep.subr.bf16.mxu0 %v1418_v29 }
  0x4f   :  { %1255 = vmatpush3.bf16.msra.mxu0 %v1254_v50  ;;  %v1302_v50 = vpack.c.bf16 %v390_v49, %v389_v48  ;;  %v572_v49 = vld [vmem:[%s2018_s9 + $0x70] sm:$0xff] }
  0x50   :  { %1256 = vmatprep.subr.bf16.mxu0 %v1418_v29 }
  0x53   :  { %1258 = vmatpush3.bf16.msra.mxu0 %v1257_v59  ;;  %v407_v59 = vld [vmem:[%s2016_s7 + $0x70] sm:$0xff] }
  0x54   :  { %1283 = vmatprep.subr.bf16.mxu0 %v1418_v29  ;;  %v1281_v61 = vpack.c.bf16 %v408_v60, %v407_v59  ;;  %v741_v60 = vld [vmem:[%s2021_s12 + $0x30] sm:$0xff] }
  0x56   :  { %1026 = vmatmul.mubr.f32.vlgmr.msra.gmra.mrb[2].mxu0 %v1692_v26 }
  0x57   :  { %1285 = vmatpush3.bf16.msra.mxu0 %v1284_v62  ;;  %1095 = vmatprep.mubr.msk.f32.mxu0 %vm1419_vm0, %v1417_v0 }
  0x58   :  { %1286 = vmatprep.subr.bf16.mxu0 %v1418_v29 }
  0x5b   :  { %1288 = vmatpush3.bf16.msra.mxu0 %v1287_v2  ;;  %v864_v2 = vld [vmem:[%s2014_s5] ss:$0 sm:$0xff] }
  0x5c   :  { %1289 = vmatprep.subr.bf16.mxu0 %v1418_v29 }
  0x5f   :  { %1291 = vmatpush3.bf16.msra.mxu0 %v1290_v5  ;;  %v575_v5 = vld [vmem:[#allocation2 + $0x8] sm:$0xff] }
  0x60   :  { %1292 = vmatprep.subr.bf16.mxu0 %v1418_v29  ;;  %v1308_v7 = vpack.c.bf16 %v575_v5, %v574_v4 }
  0x63   :  { %1294 = vmatpush3.bf16.msra.mxu0 %v1293_v8 }
  0x64   :  { %1295 = vmatprep.subr.bf16.mxu0 %v1418_v29 }
  0x67   :  { %1297 = vmatpush3.bf16.msra.mxu0 %v1296_v11  ;;  %v1311_v11 = vpack.c.bf16 %v577_v10, %v576_v9 }
  0x68   :  { %1298 = vmatprep.subr.bf16.mxu0 %v1418_v29 }
  0x6b   :  { %1300 = vmatpush3.bf16.msra.mxu0 %v1299_v14  ;;  %v1314_v14 = vpack.c.bf16 %v579_v13, %v578_v12 }
  0x6c   :  { %1301 = vmatprep.subr.bf16.mxu0 %v1418_v29 }
  0x6f   :  { %1303 = vmatpush3.bf16.msra.mxu0 %v1302_v50  ;;  %v573_v50 = vld [vmem:[%s2018_s9 + $0x78] sm:$0xff] }
  0x70   :  { %1304 = vmatprep.subr.bf16.mxu0 %v1418_v29  ;;  %v1341_v51 = vpack.c.bf16 %v573_v50, %v572_v49 }
  0x73   :  { %1306 = vmatpush3.bf16.msra.mxu0 %v1305_v58  ;;  %v740_v58 = vld [vmem:[%s2021_s12 + $0x28] sm:$0xff] }
  0x74   :  { %1343 = vmatprep.subr.bf16.mxu0 %v1418_v29 }
  0x76   :  { %1096 = vmatmul.mubr.f32.vlgmr.msra.gmra.mrb[4].mxu0 %v1692_v26 }
  0x77   :  { %1168 = vmatprep.mubr.msk.f32.mxu0 %vm1419_vm0, %v1417_v0 }
 0x109   :  { %v173_v22 = vpop.f32.mrb[0].mxu0 }
 0x10a   :  { %v174_v23 = vadd.f32 %v173_v22, %v100_v20  ;;  %v175_v24 = vpop.f32.mrb[1].mxu0  ;;  %v1317_v20 = vpack.c.bf16 %v581_v19, %v580_v18  ;;  %v865_v22 = vld [vmem:[%s2017_s8] ss:$0 sm:$0xff] }
 0x10b   :  { %v176_v28 = vadd.f32 %v175_v24, %v104_v21 }
 0x10c   :  { %v178_v32 = vmax.f32 %v174_v23, 0.0 }
 0x10d   :  { %v179_v30 = vmax.f32 %v176_v28, 0.0 }
 0x10f   :  { %292 = vmatprep.mubr.f32.mxu1 %v179_v30  ;;  %v1320_v30 = vpack.c.bf16 %v559_v27, %v558_v25 }
 0x110   :  { %293 = vmatmul.mubr.f32.vlgmr.msra.gmra.mrb[0].mxu1 %v178_v32  ;;  %v560_v32 = vld [vmem:[%s2018_s9 + $0x10] sm:$0xff] }
 0x111   :  { %1261 = vmatpush3.bf16.msra.mxu1 %v1260_v31  ;;  %1060 = vmatprep.mubr.msk.f32.mxu1 %vm1419_vm0, %v1417_v0  ;;  %v1323_v34 = vpack.c.bf16 %v561_v33, %v560_v32 }
 0x112   :  { %1262 = vmatprep.subr.bf16.mxu1 %v1418_v29 }
 0x115   :  { %1264 = vmatpush3.bf16.msra.mxu1 %v1263_v35  ;;  %v562_v35 = vld [vmem:[%s2018_s9 + $0x20] sm:$0xff] }
 0x116   :  { %1265 = vmatprep.subr.bf16.mxu1 %v1418_v29  ;;  %v1326_v37 = vpack.c.bf16 %v563_v36, %v562_v35 }
 0x119   :  { %1267 = vmatpush3.bf16.msra.mxu1 %v1266_v38  ;;  %v564_v38 = vld [vmem:[%s2018_s9 + $0x30] sm:$0xff] }
 0x11a   :  { %1268 = vmatprep.subr.bf16.mxu1 %v1418_v29 }
 0x11d   :  { %1270 = vmatpush3.bf16.msra.mxu1 %v1269_v41  ;;  %v567_v41 = vld [vmem:[%s2018_s9 + $0x48] sm:$0xff] }
 0x11e   :  { %1271 = vmatprep.subr.bf16.mxu1 %v1418_v29  ;;  %v1332_v42 = vpack.c.bf16 %v567_v41, %v566_v40 }
 0x121   :  { %1273 = vmatpush3.bf16.msra.mxu1 %v1272_v44  ;;  %v569_v44 = vld [vmem:[%s2018_s9 + $0x58] sm:$0xff] }
 0x122   :  { %1274 = vmatprep.subr.bf16.mxu1 %v1418_v29  ;;  %v1335_v45 = vpack.c.bf16 %v569_v44, %v568_v43 }
 0x125   :  { %1276 = vmatpush3.bf16.msra.mxu1 %v1275_v47  ;;  %v571_v47 = vld [vmem:[%s2018_s9 + $0x68] sm:$0xff] }
 0x126   :  { %1277 = vmatprep.subr.bf16.mxu1 %v1418_v29  ;;  %v1338_v48 = vpack.c.bf16 %v571_v47, %v570_v46 }
 0x129   :  { %v364_v54 = vpop.f32.mrb[2].mxu0  ;;  %1279 = vmatpush3.bf16.msra.mxu1 %v1278_v53  ;;  %v736_v53 = vld [vmem:[%s2021_s12 + $0x8] sm:$0xff] }
 0x12a   :  { %v1027_v55 = vpop.f32.mrb[3].mxu0  ;;  %1280 = vmatprep.subr.bf16.mxu1 %v1418_v29 }
 0x12b   :  { %v1344_v55 = vpack.c.bf16 %v736_v53, %v735_v52 }
 0x12d   :  { %1282 = vmatpush3.bf16.msra.mxu1 %v1281_v61  ;;  %1345 = vmatpush3.bf16.msra.mxu0 %v1344_v55  ;;  %v742_v61 = vld [vmem:[%s2021_s12 + $0x38] sm:$0xff] }
 0x12e   :  { %1307 = vmatprep.subr.bf16.mxu1 %v1418_v29  ;;  %1346 = vmatprep.subr.bf16.mxu0 %v1418_v29 }
 0x149   :  { %v545_v16 = vpop.f32.mrb[4].mxu0 }
 0x14a   :  { %v1097_v17 = vpop.f32.mrb[5].mxu0 }
 0x1e3   :  { %v904_v62 = vpop.f32.mrb[0].mxu1 }
 0x1e4   :  { %v905_v63 = vpop.f32.mrb[1].mxu1 }
 0x1e5   :  { %v906_v1 = vadd.f32 %v905_v63, %v904_v62  ;;  %v1353_v62 = vpack.c.bf16 %v742_v61, %v741_v60 }
 0x1e7   :  { %v365_v3 = vadd.f32 %v906_v1, %v364_v54  ;;  %v737_v54 = vld [vmem:[%s2021_s12 + $0x10] sm:$0xff] }
 0x1e8   :  { %v1347_v57 = vpack.c.bf16 %v738_v56, %v737_v54 }
 0x1e9   :  { %v375_v6 = vadd.f32 %v864_v2, %v365_v3  ;;  %v867_v3 = vld [vmem:[%s2020_s11] ss:$0 sm:$0xff]  ;;  %s1420_s11 = smov [#allocation5]  }
 0x1ea   :  { %1348 = vmatpush3.bf16.msra.mxu0 %v1347_v57 }
 0x1eb   :  { %v376_v8 = vmax.f32 %v375_v6, 0.0  ;;  %1349 = vmatprep.subr.bf16.mxu0 %v1418_v29 }
 0x1ed   :  { %1061 = vmatmul.mubr.f32.vlgmr.msra.gmra.mrb[2].mxu1 %v376_v8 }
 0x1ee   :  { %1309 = vmatpush3.bf16.msra.mxu1 %v1308_v7  ;;  %1114 = vmatprep.mubr.msk.f32.mxu1 %vm1419_vm0, %v1417_v0  ;;  %v868_v7 = vld [vmem:[%s2022_s13] ss:$0 sm:$0xff] }
 0x1ef   :  { %1310 = vmatprep.subr.bf16.mxu1 %v1418_v29 }
 0x1f2   :  { %1312 = vmatpush3.bf16.msra.mxu1 %v1311_v11 }
 0x1f3   :  { %1313 = vmatprep.subr.bf16.mxu1 %v1418_v29 }
 0x1f6   :  { %1315 = vmatpush3.bf16.msra.mxu1 %v1314_v14  ;;  %v830_v14 = vand.u32 127, %v97_v15 }
 0x1f7   :  { %1316 = vmatprep.subr.bf16.mxu1 %v1418_v29 }
 0x1fa   :  { %1318 = vmatpush3.bf16.msra.mxu1 %v1317_v20 }
 0x1fb   :  { %1319 = vmatprep.subr.bf16.mxu1 %v1418_v29 }
 0x2c0   :  { %v475_v21 = vpop.f32.mrb[2].mxu1 }
 0x2c1   :  { %v546_v23 = vadd.f32 %v545_v16, %v475_v21  ;;  %v1062_v24 = vpop.f32.mrb[3].mxu1  ;;  %v835_v16 = vand.u32 1, %v830_v14 }
 0x2c3   :  { %v556_v28 = vadd.f32 %v865_v22, %v546_v23  ;;  %vm843_vm2 = vcmp.eq.s32.totalorder %v835_v16, 0 }
 0x2c5   :  { %v557_v31 = vmax.f32 %v556_v28, 0.0 }
 0x2c7   :  { %1115 = vmatmul.mubr.msk.f32.vlgmr.msra.gmra.mrb[4].mxu1 %vm582_vm1, %v557_v31 }
 0x2c8   :  { %1321 = vmatpush3.bf16.msra.mxu1 %v1320_v30  ;;  %1149 = vmatprep.mubr.msk.f32.mxu1 %vm1419_vm0, %v1417_v0  ;;  %v565_v0 = vld [vmem:[%s2018_s9 + $0x38] sm:$0xff] }
 0x2c9   :  { %1322 = vmatprep.subr.bf16.mxu1 %v1418_v29  ;;  %v1329_v39 = vpack.c.bf16 %v565_v0, %v564_v38 }
 0x2cc   :  { %1324 = vmatpush3.bf16.msra.mxu1 %v1323_v34 }
 0x2cd   :  { %1325 = vmatprep.subr.bf16.mxu1 %v1418_v29 }
 0x2d0   :  { %1327 = vmatpush3.bf16.msra.mxu1 %v1326_v37 }
 0x2d1   :  { %1328 = vmatprep.subr.bf16.mxu1 %v1418_v29 }
 0x2d4   :  { %1330 = vmatpush3.bf16.msra.mxu1 %v1329_v39 }
 0x2d5   :  { %1331 = vmatprep.subr.bf16.mxu1 %v1418_v29 }
 0x2d8   :  { %1333 = vmatpush3.bf16.msra.mxu1 %v1332_v42 }
 0x2d9   :  { %1334 = vmatprep.subr.bf16.mxu1 %v1418_v29 }
 0x2dc   :  { %1336 = vmatpush3.bf16.msra.mxu1 %v1335_v45 }
 0x2dd   :  { %1337 = vmatprep.subr.bf16.mxu1 %v1418_v29 }
 0x2e0   :  { %1339 = vmatpush3.bf16.msra.mxu1 %v1338_v48 }
 0x2e1   :  { %1340 = vmatprep.subr.bf16.mxu1 %v1418_v29 }
 0x2e4   :  { %1342 = vmatpush3.bf16.msra.mxu1 %v1341_v51 }
 0x2e7   :  { %1150 = vmatmul.mubr.f32.vlgmr.msra.gmra.mrb[6].mxu1 %v1692_v26  ;;  %v739_v26 = vld [vmem:[%s2021_s12 + $0x20] sm:$0xff]  ;;  %s855_s12 = sshll.u32 %s1420_s11, 4  ;;  %s856_s12 = int_to_ptr.vmem [resolvable:$true] %s855_s12 }
 0x2e8   :  { %v1350_v59 = vpack.c.bf16 %v740_v58, %v739_v26  ;;  %s1388_s13 = scalar_lea.vmem %s856_s12, 128  ;;  %p1393_p9 = scmp.lt.s32.totalorder %s856_s12, %s856_s12 }
 0x2e9   :  { %p1389_p8 = scmp.ne.s32.totalorder %s856_s12, %s1388_s13  ;;  %p1394_p10 = scmp.lt.s32.totalorder %s1388_s13, %s1388_s13 }
 0x2ea   :  { %1351 = vmatpush3.bf16.msra.mxu0 %v1350_v59 }
 0x2eb   :  { %1352 = vmatprep.subr.bf16.mxu0 %v1418_v29  ;;  %p1395_p11 = por %p1394_p10, %p1393_p9 }
 0x2ed   :  { %p1396_p12 = pnand %p1395_p11, %p1389_p8 }
 0x2ee   :  { %1354 = vmatpush3.bf16.msra.mxu0 %v1353_v62 }
 0x39a   :  { %v652_v63 = vpop.f32.mrb[4].mxu1 }
 0x39b   :  { %v1116_v1 = vpop.f32.mrb[5].mxu1 }
 0x3ba   :  { %v722_v2 = vpop.f32.mrb[6].mxu1 }
 0x3bb   :  { %v723_v4 = vadd.f32 %v722_v2, %v652_v63  ;;  %v1151_v5 = vpop.f32.mrb[7].mxu1 }
 0x3bd   :  { %v733_v29 = vadd.f32 %v867_v3, %v723_v4 }
 0x3bf   :  { %v734_v6 = vmax.f32 %v733_v29, 0.0 }
 0x3c1   :  { %1169 = vmatmul.mubr.msk.f32.vlgmr.msra.gmra.mrb[6].mxu0 %vm582_vm1, %v734_v6 }
 0x494   :  { %v819_v8 = vpop.f32.mrb[6].mxu0 }
 0x495   :  { %v820_v9 = vadd.f32 %v868_v7, %v819_v8  ;;  %v1170_v10 = vpop.f32.mrb[7].mxu0 }
 0x497   :  { %v870_v11 = vmul.f32 -1.442695, %v820_v9 }
 0x499   :  { %1362 = vpow2.f32 %v870_v11 }
 0x4a3   :  { %v1363_v12 = vpop.eup %1362 }
 0x4a4   :  { %v826_v13 = vadd.f32 1.0, %v1363_v12 }
 0x4a6   :  { %1364 = vrcp.f32 %v826_v13 }
 0x4b0   :  { %v1365_v17 = vpop.eup %1364 }
 0x4b1   :  { %v844_v18 = vmul.f32 2.0, %v1365_v17 }
 0x4b3   :  { %v871_v19 = vadd.f32 -1.0, %v844_v18 }
 0x4b5   :  { %v846_v20 = vsel %vm843_vm2, %v871_v19, %v1365_v17 }
 0x4b6   :  { %848 = vst.msk [vmem:[#allocation5] sm:$0xff] %vm847_vm3, %v846_v20 }
 0x4b7   :  { %1399 = shalt.err (!%p1396_p12)
}
 0x4b8   :  { %s1400_s0 = scalar_lea.hbm %s2023_s14, 128 }
 0x4b9   :  { %p1401_p13 = scmp.ne.s32.totalorder %s2023_s14, %s1400_s0  ;;  %p1404_p0 = scmp.lt.u32.totalorder %s1400_s0, %s2023_s14 }
 0x4bb   :  { %p1406_p1 = pnand %p1404_p0, %p1401_p13 }
 0x4bd   :  { %1409 = shalt.err (!%p1406_p1)
}
 0x4be   :  { %858 = dma.vmem_to_hbm [thread:$0]  %s856_s12, 128, %s2023_s14, [#allocation4]  }
 0x4bf   :  { %1412 = dma.done.wait [#allocation4], 128  }
 0x4c0   :  { %1413 = vsyncadd [#allocation4], 4294967168 }
 0x4c1   :  { %862 = vsyncpa [#allocation3], 1 }
 0x4c2   :  { %863 = vsyncpa [#allocation4], 1 }

</bundles_post_ra>
